<compile_context>
chip_gen: v7x
topology: tpu7x:2x2x1
jax: 0.10.0
libtpu: 0.0.40
codegen_flags: <defaults>
</compile_context>

<pallas_src>
import jax
import jax.numpy as jnp
from jax import lax
from jax.experimental import pallas as pl
from jax.experimental.pallas import tpu as pltpu


def _rnn_kernel(tok_ref, emb_ref, wih_t_ref, whh_t_ref, out_ref):
    """Fused embedding + Elman RNN recurrence, fully resident in VMEM.

    tok_ref  : (T*Bp, 1) int32   time-major, batch-padded token ids
    emb_ref  : (V, D)    f32     embedding table (row 0 zeroed = padding_idx)
    wih_t_ref: (D, Hp)   f32     W_ih^T, zero-padded columns H..Hp
    whh_t_ref: (Hp, Hp)  f32     W_hh^T, zero-padded rows & columns H..Hp
    out_ref  : (T, Bp, Hp) f32   hidden state at every step (lane-dense)
    """
    T, Bp, Hp = out_ref.shape
    V, _ = emb_ref.shape
    TB = T * Bp

    # ---- fused embedding gather (one-hot matmul; V is tiny) -------------------
    tok = tok_ref[...]                                               # (TB, 1) int32
    onehot = (tok == lax.broadcasted_iota(jnp.int32, (TB, V), 1)
              ).astype(jnp.float32)                                  # (TB, V)
    x_flat = jnp.dot(onehot, emb_ref[...],
                     preferred_element_type=jnp.float32)             # (TB, D)

    # ---- hoisted input projection: one big matmul instead of T tiny ones ------
    pre_x = jnp.dot(x_flat, wih_t_ref[...],
                    preferred_element_type=jnp.float32)              # (TB, Hp)

    # ---- serial recurrence, fully unrolled (T static & small) -----------------
    whh_t = whh_t_ref[...]                                           # (Hp, Hp)
    h = jnp.zeros((Bp, Hp), jnp.float32)
    for t in range(T):
        pre_t = pre_x[t * Bp:(t + 1) * Bp, :]        # static, tile-aligned slice
        h = jnp.tanh(pre_t + jnp.dot(h, whh_t,
                                     preferred_element_type=jnp.float32))
        out_ref[t] = h                               # full (8,128) unmasked store


def rnn_cross_forward(token_ids, emb_table, w_ih, w_hh):
    """Forward pass of RnnCrossModel (inference path, y=None)."""
    B, T = token_ids.shape
    V, D = emb_table.shape
    H = w_hh.shape[0]

    Bp = ((B + 7) // 8) * 8          # sublane-pad batch to the f32 tile (8)
    Hp = ((H + 127) // 128) * 128    # lane-pad hidden to 128 (lane-dense output)

    # Zero-padded, pre-transposed weights. Padded rows AND columns are zero so the
    # padded hidden lanes stay exactly 0 through the recurrence (tanh(0)=0).
    wih_t_pad = jnp.zeros((D, Hp), jnp.float32).at[:, :H].set(
        w_ih.T.astype(jnp.float32))
    whh_t_pad = jnp.zeros((Hp, Hp), jnp.float32).at[:H, :H].set(
        w_hh.T.astype(jnp.float32))

    # Time-major, batch-padded token ids flattened to (T*Bp, 1) for the in-kernel
    # one-hot gather. Pad rows use token 0 (padding_idx -> zero embedding row),
    # and padded batch rows never mix into real rows (row-wise recurrence).
    tok_p = jnp.zeros((Bp, T), jnp.int32).at[:B, :].set(token_ids.astype(jnp.int32))
    tok_flat = jnp.transpose(tok_p, (1, 0)).reshape(T * Bp, 1)

    out_tm = pl.pallas_call(
        _rnn_kernel,
        out_shape=jax.ShapeDtypeStruct((T, Bp, Hp), jnp.float32),
        in_specs=[
            pl.BlockSpec(memory_space=pltpu.MemorySpace.VMEM),  # token ids
            pl.BlockSpec(memory_space=pltpu.MemorySpace.VMEM),  # embedding table
            pl.BlockSpec(memory_space=pltpu.MemorySpace.VMEM),  # W_ih^T (padded)
            pl.BlockSpec(memory_space=pltpu.MemorySpace.VMEM),  # W_hh^T (padded)
        ],
        out_specs=pl.BlockSpec(memory_space=pltpu.MemorySpace.VMEM),
    )(tok_flat, emb_table.astype(jnp.float32), wih_t_pad, whh_t_pad)

    output = jnp.transpose(out_tm[:, :B, :H], (1, 0, 2))   # (B, T, H) batch_first
    h_n = output[:, -1][None]                              # (1, B, H) == nn.RNN h_n
    return output, h_n


def _reference_forward(token_ids, emb_table, w_ih, w_hh):
    """Pure-JAX reference matching torch.nn.RNN(bias=False, batch_first=True)."""
    x_emb = emb_table[token_ids]                # (B, T, D)
    B, T, _ = x_emb.shape
    H = w_hh.shape[0]

    def step(h, x_t):
        h_new = jnp.tanh(x_t @ w_ih.T + h @ w_hh.T)
        return h_new, h_new

    h0 = jnp.zeros((B, H), jnp.float32)
    h_last, ys = lax.scan(step, h0, jnp.transpose(x_emb, (1, 0, 2)))
    return jnp.transpose(ys, (1, 0, 2)), h_last[None]


if __name__ == "__main__":
    # Small shapes consistent with the module.
    vocab_size = 10     # len(vocab)
    input_size = 16     # D
    hidden_size = 32    # H
    batch = 2           # B
    seq_len = 8         # T

    key = jax.random.PRNGKey(0)
    k_emb, k_ih, k_hh, k_x = jax.random.split(key, 4)

    # Deterministic parameter init (PyTorch-like).
    emb_table = jax.random.normal(k_emb, (vocab_size, input_size), jnp.float32)
    emb_table = emb_table.at[0].set(0.0)        # padding_idx=0
    bound = 1.0 / jnp.sqrt(hidden_size)
    w_ih = jax.random.uniform(k_ih, (hidden_size, input_size), jnp.float32,
                              minval=-bound, maxval=bound)
    w_hh = jax.random.uniform(k_hh, (hidden_size, hidden_size), jnp.float32,
                              minval=-bound, maxval=bound)

    token_ids = jax.random.randint(k_x, (batch, seq_len), 0, vocab_size, jnp.int32)

    out, h_n = jax.jit(rnn_cross_forward)(token_ids, emb_table, w_ih, w_hh)
    jax.block_until_ready((out, h_n))

    ref_out, ref_hn = _reference_forward(token_ids, emb_table, w_ih, w_hh)
    assert out.shape == (batch, seq_len, hidden_size)
    assert h_n.shape == (1, batch, hidden_size)
    assert jnp.allclose(out, ref_out, atol=1e-5, rtol=1e-5)
    assert jnp.allclose(h_n, ref_hn, atol=1e-5, rtol=1e-5)

    # TODO(synk): the `y is not None` branch calls cross_entropy on the nn.RNN
    # output *tuple*, which is a runtime error in the original PyTorch code, so
    # only the inference path (y=None) is implemented.
    print("KERNEL_OK")
</pallas_src>

<mosaic_0001>
module attributes {stable_mosaic.version = 11 : i64} {
  func.func @_rnn_kernel(%arg0: memref<64x1xi32, #tpu.memory_space<vmem>>, %arg1: memref<10x16xf32, #tpu.memory_space<vmem>>, %arg2: memref<16x128xf32, #tpu.memory_space<vmem>>, %arg3: memref<128x128xf32, #tpu.memory_space<vmem>>, %arg4: memref<8x8x128xf32, #tpu.memory_space<vmem>>) attributes {dimension_semantics = [], scalar_prefetch = 0 : i64, scratch_operands = 0 : i64, tpu.core_type = #tpu.core_type<tc>} {
    %c0 = arith.constant 0 : index
    %c0_0 = arith.constant 0 : index
    %0 = vector.load %arg0[%c0, %c0_0] : memref<64x1xi32, #tpu.memory_space<vmem>>, vector<64x1xi32>
    %1 = tpu.iota {dimensions = array<i32: 1>} : vector<64x10xi32>
    %2 = vector.broadcast %0 : vector<64x1xi32> to vector<64x10xi32>
    %3 = arith.cmpi eq, %2, %1 : vector<64x10xi32>
    %4 = arith.extui %3 : vector<64x10xi1> to vector<64x10xi32>
    %5 = arith.sitofp %4 : vector<64x10xi32> to vector<64x10xf32>
    %c0_1 = arith.constant 0 : index
    %c0_2 = arith.constant 0 : index
    %6 = vector.load %arg1[%c0_1, %c0_2] : memref<10x16xf32, #tpu.memory_space<vmem>>, vector<10x16xf32>
    %cst = arith.constant dense<0.000000e+00> : vector<64x16xf32>
    %7 = tpu.matmul %5, %6, %cst {dimension_numbers = #tpu.dot_dimension_numbers<[1], [0], [0], [1], [0, 0, 1, 1], [], []>} : vector<64x10xf32>, vector<10x16xf32>, vector<64x16xf32> -> vector<64x16xf32>
    %c0_3 = arith.constant 0 : index
    %c0_4 = arith.constant 0 : index
    %8 = vector.load %arg2[%c0_3, %c0_4] : memref<16x128xf32, #tpu.memory_space<vmem>>, vector<16x128xf32>
    %cst_5 = arith.constant dense<0.000000e+00> : vector<64x128xf32>
    %9 = tpu.matmul %7, %8, %cst_5 {dimension_numbers = #tpu.dot_dimension_numbers<[1], [0], [0], [1], [0, 0, 1, 1], [], []>} : vector<64x16xf32>, vector<16x128xf32>, vector<64x128xf32> -> vector<64x128xf32>
    %c0_6 = arith.constant 0 : index
    %c0_7 = arith.constant 0 : index
    %10 = vector.load %arg3[%c0_6, %c0_7] : memref<128x128xf32, #tpu.memory_space<vmem>>, vector<128x128xf32>
    %cst_8 = arith.constant 0.000000e+00 : f32
    %11 = vector.broadcast %cst_8 : f32 to vector<8x128xf32>
    %12 = vector.extract_strided_slice %9 {offsets = [0, 0], sizes = [8, 128], strides = [1, 1]} : vector<64x128xf32> to vector<8x128xf32>
    %cst_9 = arith.constant dense<0.000000e+00> : vector<8x128xf32>
    %13 = tpu.matmul %11, %10, %cst_9 {dimension_numbers = #tpu.dot_dimension_numbers<[1], [0], [0], [1], [0, 0, 1, 1], [], []>} : vector<8x128xf32>, vector<128x128xf32>, vector<8x128xf32> -> vector<8x128xf32>
    %14 = arith.addf %12, %13 : vector<8x128xf32>
    %15 = math.tanh %14 : vector<8x128xf32>
    %c0_10 = arith.constant 0 : index
    %c0_11 = arith.constant 0 : index
    %c0_12 = arith.constant 0 : index
    %16 = vector.load %arg4[%c0_10, %c0_11, %c0_12] : memref<8x8x128xf32, #tpu.memory_space<vmem>>, vector<1x8x128xf32>
    %17 = vector.shape_cast %16 : vector<1x8x128xf32> to vector<8x128xf32>
    %18 = vector.shape_cast %15 : vector<8x128xf32> to vector<1x8x128xf32>
    tpu.vector_store %arg4[%c0_10, %c0_11, %c0_12], %18 {strides = array<i32>} : memref<8x8x128xf32, #tpu.memory_space<vmem>>, vector<1x8x128xf32>,
    %19 = vector.extract_strided_slice %9 {offsets = [8, 0], sizes = [8, 128], strides = [1, 1]} : vector<64x128xf32> to vector<8x128xf32>
    %cst_13 = arith.constant dense<0.000000e+00> : vector<8x128xf32>
    %20 = tpu.matmul %15, %10, %cst_13 {dimension_numbers = #tpu.dot_dimension_numbers<[1], [0], [0], [1], [0, 0, 1, 1], [], []>} : vector<8x128xf32>, vector<128x128xf32>, vector<8x128xf32> -> vector<8x128xf32>
    %21 = arith.addf %19, %20 : vector<8x128xf32>
    %22 = math.tanh %21 : vector<8x128xf32>
    %c1 = arith.constant 1 : index
    %c0_14 = arith.constant 0 : index
    %c0_15 = arith.constant 0 : index
    %23 = vector.load %arg4[%c1, %c0_14, %c0_15] : memref<8x8x128xf32, #tpu.memory_space<vmem>>, vector<1x8x128xf32>
    %24 = vector.shape_cast %23 : vector<1x8x128xf32> to vector<8x128xf32>
    %25 = vector.shape_cast %22 : vector<8x128xf32> to vector<1x8x128xf32>
    tpu.vector_store %arg4[%c1, %c0_14, %c0_15], %25 {strides = array<i32>} : memref<8x8x128xf32, #tpu.memory_space<vmem>>, vector<1x8x128xf32>,
    %26 = vector.extract_strided_slice %9 {offsets = [16, 0], sizes = [8, 128], strides = [1, 1]} : vector<64x128xf32> to vector<8x128xf32>
    %cst_16 = arith.constant dense<0.000000e+00> : vector<8x128xf32>
    %27 = tpu.matmul %22, %10, %cst_16 {dimension_numbers = #tpu.dot_dimension_numbers<[1], [0], [0], [1], [0, 0, 1, 1], [], []>} : vector<8x128xf32>, vector<128x128xf32>, vector<8x128xf32> -> vector<8x128xf32>
    %28 = arith.addf %26, %27 : vector<8x128xf32>
    %29 = math.tanh %28 : vector<8x128xf32>
    %c2 = arith.constant 2 : index
    %c0_17 = arith.constant 0 : index
    %c0_18 = arith.constant 0 : index
    %30 = vector.load %arg4[%c2, %c0_17, %c0_18] : memref<8x8x128xf32, #tpu.memory_space<vmem>>, vector<1x8x128xf32>
    %31 = vector.shape_cast %30 : vector<1x8x128xf32> to vector<8x128xf32>
    %32 = vector.shape_cast %29 : vector<8x128xf32> to vector<1x8x128xf32>
    tpu.vector_store %arg4[%c2, %c0_17, %c0_18], %32 {strides = array<i32>} : memref<8x8x128xf32, #tpu.memory_space<vmem>>, vector<1x8x128xf32>,
    %33 = vector.extract_strided_slice %9 {offsets = [24, 0], sizes = [8, 128], strides = [1, 1]} : vector<64x128xf32> to vector<8x128xf32>
    %cst_19 = arith.constant dense<0.000000e+00> : vector<8x128xf32>
    %34 = tpu.matmul %29, %10, %cst_19 {dimension_numbers = #tpu.dot_dimension_numbers<[1], [0], [0], [1], [0, 0, 1, 1], [], []>} : vector<8x128xf32>, vector<128x128xf32>, vector<8x128xf32> -> vector<8x128xf32>
    %35 = arith.addf %33, %34 : vector<8x128xf32>
    %36 = math.tanh %35 : vector<8x128xf32>
    %c3 = arith.constant 3 : index
    %c0_20 = arith.constant 0 : index
    %c0_21 = arith.constant 0 : index
    %37 = vector.load %arg4[%c3, %c0_20, %c0_21] : memref<8x8x128xf32, #tpu.memory_space<vmem>>, vector<1x8x128xf32>
    %38 = vector.shape_cast %37 : vector<1x8x128xf32> to vector<8x128xf32>
    %39 = vector.shape_cast %36 : vector<8x128xf32> to vector<1x8x128xf32>
    tpu.vector_store %arg4[%c3, %c0_20, %c0_21], %39 {strides = array<i32>} : memref<8x8x128xf32, #tpu.memory_space<vmem>>, vector<1x8x128xf32>,
    %40 = vector.extract_strided_slice %9 {offsets = [32, 0], sizes = [8, 128], strides = [1, 1]} : vector<64x128xf32> to vector<8x128xf32>
    %cst_22 = arith.constant dense<0.000000e+00> : vector<8x128xf32>
    %41 = tpu.matmul %36, %10, %cst_22 {dimension_numbers = #tpu.dot_dimension_numbers<[1], [0], [0], [1], [0, 0, 1, 1], [], []>} : vector<8x128xf32>, vector<128x128xf32>, vector<8x128xf32> -> vector<8x128xf32>
    %42 = arith.addf %40, %41 : vector<8x128xf32>
    %43 = math.tanh %42 : vector<8x128xf32>
    %c4 = arith.constant 4 : index
    %c0_23 = arith.constant 0 : index
    %c0_24 = arith.constant 0 : index
    %44 = vector.load %arg4[%c4, %c0_23, %c0_24] : memref<8x8x128xf32, #tpu.memory_space<vmem>>, vector<1x8x128xf32>
    %45 = vector.shape_cast %44 : vector<1x8x128xf32> to vector<8x128xf32>
    %46 = vector.shape_cast %43 : vector<8x128xf32> to vector<1x8x128xf32>
    tpu.vector_store %arg4[%c4, %c0_23, %c0_24], %46 {strides = array<i32>} : memref<8x8x128xf32, #tpu.memory_space<vmem>>, vector<1x8x128xf32>,
    %47 = vector.extract_strided_slice %9 {offsets = [40, 0], sizes = [8, 128], strides = [1, 1]} : vector<64x128xf32> to vector<8x128xf32>
    %cst_25 = arith.constant dense<0.000000e+00> : vector<8x128xf32>
    %48 = tpu.matmul %43, %10, %cst_25 {dimension_numbers = #tpu.dot_dimension_numbers<[1], [0], [0], [1], [0, 0, 1, 1], [], []>} : vector<8x128xf32>, vector<128x128xf32>, vector<8x128xf32> -> vector<8x128xf32>
    %49 = arith.addf %47, %48 : vector<8x128xf32>
    %50 = math.tanh %49 : vector<8x128xf32>
    %c5 = arith.constant 5 : index
    %c0_26 = arith.constant 0 : index
    %c0_27 = arith.constant 0 : index
    %51 = vector.load %arg4[%c5, %c0_26, %c0_27] : memref<8x8x128xf32, #tpu.memory_space<vmem>>, vector<1x8x128xf32>
    %52 = vector.shape_cast %51 : vector<1x8x128xf32> to vector<8x128xf32>
    %53 = vector.shape_cast %50 : vector<8x128xf32> to vector<1x8x128xf32>
    tpu.vector_store %arg4[%c5, %c0_26, %c0_27], %53 {strides = array<i32>} : memref<8x8x128xf32, #tpu.memory_space<vmem>>, vector<1x8x128xf32>,
    %54 = vector.extract_strided_slice %9 {offsets = [48, 0], sizes = [8, 128], strides = [1, 1]} : vector<64x128xf32> to vector<8x128xf32>
    %cst_28 = arith.constant dense<0.000000e+00> : vector<8x128xf32>
    %55 = tpu.matmul %50, %10, %cst_28 {dimension_numbers = #tpu.dot_dimension_numbers<[1], [0], [0], [1], [0, 0, 1, 1], [], []>} : vector<8x128xf32>, vector<128x128xf32>, vector<8x128xf32> -> vector<8x128xf32>
    %56 = arith.addf %54, %55 : vector<8x128xf32>
    %57 = math.tanh %56 : vector<8x128xf32>
    %c6 = arith.constant 6 : index
    %c0_29 = arith.constant 0 : index
    %c0_30 = arith.constant 0 : index
    %58 = vector.load %arg4[%c6, %c0_29, %c0_30] : memref<8x8x128xf32, #tpu.memory_space<vmem>>, vector<1x8x128xf32>
    %59 = vector.shape_cast %58 : vector<1x8x128xf32> to vector<8x128xf32>
    %60 = vector.shape_cast %57 : vector<8x128xf32> to vector<1x8x128xf32>
    tpu.vector_store %arg4[%c6, %c0_29, %c0_30], %60 {strides = array<i32>} : memref<8x8x128xf32, #tpu.memory_space<vmem>>, vector<1x8x128xf32>,
    %61 = vector.extract_strided_slice %9 {offsets = [56, 0], sizes = [8, 128], strides = [1, 1]} : vector<64x128xf32> to vector<8x128xf32>
    %cst_31 = arith.constant dense<0.000000e+00> : vector<8x128xf32>
    %62 = tpu.matmul %57, %10, %cst_31 {dimension_numbers = #tpu.dot_dimension_numbers<[1], [0], [0], [1], [0, 0, 1, 1], [], []>} : vector<8x128xf32>, vector<128x128xf32>, vector<8x128xf32> -> vector<8x128xf32>
    %63 = arith.addf %61, %62 : vector<8x128xf32>
    %64 = math.tanh %63 : vector<8x128xf32>
    %c7 = arith.constant 7 : index
    %c0_32 = arith.constant 0 : index
    %c0_33 = arith.constant 0 : index
    %65 = vector.load %arg4[%c7, %c0_32, %c0_33] : memref<8x8x128xf32, #tpu.memory_space<vmem>>, vector<1x8x128xf32>
    %66 = vector.shape_cast %65 : vector<1x8x128xf32> to vector<8x128xf32>
    %67 = vector.shape_cast %64 : vector<8x128xf32> to vector<1x8x128xf32>
    tpu.vector_store %arg4[%c7, %c0_32, %c0_33], %67 {strides = array<i32>} : memref<8x8x128xf32, #tpu.memory_space<vmem>>, vector<1x8x128xf32>,
    return
  }
}

</mosaic_0001>

<bundles_post_ra>
// kernel: rnn_cross_forward.1
= control target key start
LH: loop header
LB: loop body
LE: loop exit
PB: predicated region body
PF: predicated region fallthrough
CT: control target
= control target key end

     0   :  { %v1679_v0 = vmov 0   ;;  %vm102_vm0 = vcmask 1041408   ;;  %vm1680_vm1 = vmmov 1   ;;  %v1681_v12 = vmov 0.0|0.0   ;;  %s2017_s0 = inlined_call_operand.vmem [shape: s32[64,1], index: 0, kind: input, shape index: {}]   ;;  %s2018_s1 = inlined_call_operand.vmem [shape: f32[10,16], index: 1, kind: input, shape index: {}]   ;;  %s2019_s2 = inlined_call_operand.vmem [shape: f32[16,128], index: 2, kind: input, shape index: {}]   ;;  %s2020_s3 = inlined_call_operand.vmem [shape: f32[128,128], index: 3, kind: input, shape index: {}]   ;;  %s2021_s4 = inlined_call_operand.vmem [shape: f32[8,8,128], index: 4, kind: output, shape index: {}]  }
   0x1   :  { %1661 = vset.pattern.permute.xlu0 %v1679_v0  ;;  %v17_v1 = vld [vmem:[%s2017_s0] sm:$0xff]  ;;  %1662 = vset.pattern.permute.xlu1 %v1679_v0  ;;  %v19_v2 = vld [vmem:[%s2017_s0 + $0x10] sm:$0xff]  ;;  %v18_v3 = vld [vmem:[%s2017_s0 + $0x8] sm:$0xff]  ;;  %v25_v16 = vlaneseq  ;;  %vm77_vm3 = vcmask 80896   ;;  %v1682_v22 = vmov 0.0   ;;  %vm1683_vm12 = vmmov 0  }
   0x2   :  { %28 = vperm.xlu0 %1661, %v17_v1   ;;  %34 = vperm.xlu1 %1662, %v19_v2   ;;  %v20_v4 = vld [vmem:[%s2017_s0 + $0x18] sm:$0xff]  ;;  %v75_v5 = vld [vmem:[%s2018_s1] sm:$0xff]  ;;  %v76_v6 = vld [vmem:[%s2018_s1 + $0x8] sm:$0x3]  ;;  %vm213_vm13 = vcmask 130048  }
   0x3   :  { %v1454_v7 = vpack.c.bf16 %v76_v6, %v75_v5  ;;  %vm1455_vm2 = vmpackc.low %vm102_vm0, %vm1680_vm1  ;;  %v21_v8 = vld [vmem:[%s2017_s0 + $0x20] sm:$0xff]  ;;  %v22_v9 = vld [vmem:[%s2017_s0 + $0x28] sm:$0xff]  ;;  %v26_v17 = vand.u32 127, %v25_v16 }
   0x4   :  { %v23_v10 = vld [vmem:[%s2017_s0 + $0x30] sm:$0xff]  ;;  %v24_v11 = vld [vmem:[%s2017_s0 + $0x38] sm:$0xff]  ;;  %v211_v13 = vld [vmem:[%s2019_s2] sm:$0xff] }
   0x5   :  { %1456 = vmatprep.subr.msk.bf16.mxu0 %vm1455_vm2, %v1454_v7  ;;  %v212_v14 = vld [vmem:[%s2019_s2 + $0x8] sm:$0xff]  ;;  %v343_v20 = vld [vmem:[%s2020_s3] sm:$0xff]  ;;  %v345_v28 = vld [vmem:[%s2020_s3 + $0x10] sm:$0xff] }
   0x6   :  { %31 = vperm.xlu0 %1661, %v18_v3   ;;  %37 = vperm.xlu1 %1662, %v20_v4   ;;  %v1460_v15 = vpack.c.bf16 %v212_v14, %v211_v13  ;;  %v344_v21 = vld [vmem:[%s2020_s3 + $0x8] sm:$0xff]  ;;  %v346_v29 = vld [vmem:[%s2020_s3 + $0x18] sm:$0xff]  ;;  %v347_v35 = vld [vmem:[%s2020_s3 + $0x20] sm:$0xff] }
   0x7   :  { %1459 = vmatpush3.bf16.msk.msra.mxu0 %vm1455_vm2, %v1454_v7  ;;  %v1755_v26 = vpack.c.bf16 %v344_v21, %v343_v20  ;;  %v1769_v34 = vpack.c.bf16 %v346_v29, %v345_v28  ;;  %v348_v36 = vld [vmem:[%s2020_s3 + $0x28] sm:$0xff]  ;;  %v349_v41 = vld [vmem:[%s2020_s3 + $0x30] sm:$0xff]  ;;  %v350_v42 = vld [vmem:[%s2020_s3 + $0x38] sm:$0xff] }
   0x8   :  { %1464 = vmatprep.subr.bf16.mxu0 %v1681_v12  ;;  %1461 = vmatprep.subr.bf16.mxu1 %v1460_v15  ;;  %v1783_v40 = vpack.c.bf16 %v348_v36, %v347_v35  ;;  %v1796_v45 = vpack.c.bf16 %v350_v42, %v349_v41  ;;  %v351_v46 = vld [vmem:[%s2020_s3 + $0x40] sm:$0xff]  ;;  %v352_v47 = vld [vmem:[%s2020_s3 + $0x48] sm:$0xff]  ;;  %v353_v50 = vld [vmem:[%s2020_s3 + $0x50] sm:$0xff] }
   0x9   :  { %1463 = vmatpush3.bf16.msra.mxu1 %v1460_v15  ;;  %v1808_v49 = vpack.c.bf16 %v352_v47, %v351_v46  ;;  %v354_v51 = vld [vmem:[%s2020_s3 + $0x58] sm:$0xff]  ;;  %v355_v53 = vld [vmem:[%s2020_s3 + $0x60] sm:$0xff]  ;;  %v356_v54 = vld [vmem:[%s2020_s3 + $0x68] sm:$0xff] }
   0xa   :  { %40 = vperm.xlu0 %1661, %v21_v8   ;;  %43 = vperm.xlu1 %1662, %v22_v9   ;;  %v1818_v52 = vpack.c.bf16 %v354_v51, %v353_v50  ;;  %v1828_v55 = vpack.c.bf16 %v356_v54, %v355_v53  ;;  %v357_v56 = vld [vmem:[%s2020_s3 + $0x70] sm:$0xff]  ;;  %v358_v57 = vld [vmem:[%s2020_s3 + $0x78] sm:$0xff] }
   0xb   :  { %1488 = vmatprep.subr.bf16.mxu1 %v1681_v12  ;;  %v1839_v58 = vpack.c.bf16 %v358_v57, %v357_v56 }
   0xe   :  { %46 = vperm.xlu0 %1661, %v23_v10   ;;  %49 = vperm.xlu1 %1662, %v24_v11  }
  0x81   :  { %v29_v18 = vpop.permute.xlu0 %28  ;;  %v35_v19 = vpop.permute.xlu1 %34 }
  0x82   :  { %vm51_vm4 = vcmp.eq.s32.totalorder %v29_v18, %v26_v17  ;;  %vm53_vm5 = vcmp.eq.s32.totalorder %v35_v19, %v26_v17 }
  0x83   :  { %v954_v23 = vsel %vm51_vm4, 1.0, %v1682_v22  ;;  %v956_v27 = vsel %vm53_vm5, 1.0, %v1682_v22 }
  0x84   :  { %1146 = vmatprep.mubr.msk.f32.mxu0 %vm77_vm3, %v954_v23 }
  0x85   :  { %v32_v24 = vpop.permute.xlu0 %31  ;;  %v38_v25 = vpop.permute.xlu1 %37 }
  0x86   :  { %vm52_vm6 = vcmp.eq.s32.totalorder %v32_v24, %v26_v17  ;;  %vm54_vm7 = vcmp.eq.s32.totalorder %v38_v25, %v26_v17 }
  0x87   :  { %v955_v30 = vsel %vm52_vm6, 1.0, %v1682_v22  ;;  %v957_v31 = vsel %vm54_vm7, 1.0, %v1682_v22 }
  0x88   :  { %1147 = vmatmul.mubr.msk.f32.vlgmr.msra.gmra.mrb[0].mxu0 %vm77_vm3, %v955_v30 }
  0x89   :  { %v41_v32 = vpop.permute.xlu0 %40  ;;  %1149 = vmatprep.mubr.msk.f32.mxu0 %vm77_vm3, %v956_v27  ;;  %v44_v33 = vpop.permute.xlu1 %43  ;;  %1466 = vmatpush3.bf16.msra.mxu0 %v1755_v26 }
  0x8a   :  { %vm55_vm8 = vcmp.eq.s32.totalorder %v41_v32, %v26_v17  ;;  %vm56_vm9 = vcmp.eq.s32.totalorder %v44_v33, %v26_v17  ;;  %1467 = vmatprep.subr.bf16.mxu0 %v1681_v12 }
  0x8b   :  { %v958_v37 = vsel %vm55_vm8, 1.0, %v1682_v22  ;;  %v959_v38 = vsel %vm56_vm9, 1.0, %v1682_v22 }
  0x8c   :  { %1150 = vmatmul.mubr.msk.f32.gmra.mrb[2].mxu0 %vm77_vm3, %v957_v31 }
  0x8d   :  { %1152 = vmatprep.mubr.msk.f32.mxu0 %vm77_vm3, %v958_v37  ;;  %v47_v39 = vpop.permute.xlu0 %46  ;;  %1469 = vmatpush3.bf16.msra.mxu0 %v1769_v34  ;;  %v50_v44 = vpop.permute.xlu1 %49 }
  0x8e   :  { %vm57_vm10 = vcmp.eq.s32.totalorder %v47_v39, %v26_v17  ;;  %1470 = vmatprep.subr.bf16.mxu0 %v1681_v12  ;;  %vm58_vm11 = vcmp.eq.s32.totalorder %v50_v44, %v26_v17 }
  0x8f   :  { %v960_v43 = vsel %vm57_vm10, 1.0, %v1682_v22  ;;  %v961_v48 = vsel %vm58_vm11, 1.0, %v1682_v22 }
  0x90   :  { %1153 = vmatmul.mubr.msk.f32.gmra.mrb[4].mxu0 %vm77_vm3, %v959_v38 }
  0x91   :  { %1155 = vmatprep.mubr.msk.f32.mxu0 %vm77_vm3, %v960_v43  ;;  %1472 = vmatpush3.bf16.msra.mxu0 %v1783_v40 }
  0x92   :  { %1473 = vmatprep.subr.bf16.mxu0 %v1681_v12 }
  0x94   :  { %1156 = vmatmul.mubr.msk.f32.gmra.mrb[6].mxu0 %vm77_vm3, %v961_v48 }
  0x95   :  { %1475 = vmatpush3.bf16.msra.mxu0 %v1796_v45  ;;  %1206 = vmatprep.mubr.msk.f32.mxu0 %vm1683_vm12, %v1682_v22 }
  0x96   :  { %1476 = vmatprep.subr.bf16.mxu0 %v1681_v12 }
  0x99   :  { %1478 = vmatpush3.bf16.msra.mxu0 %v1808_v49 }
  0x9a   :  { %1479 = vmatprep.subr.bf16.mxu0 %v1681_v12 }
  0x9d   :  { %1481 = vmatpush3.bf16.msra.mxu0 %v1818_v52 }
  0x9e   :  { %1482 = vmatprep.subr.bf16.mxu0 %v1681_v12 }
  0xa1   :  { %1484 = vmatpush3.bf16.msra.mxu0 %v1828_v55 }
  0xa2   :  { %1485 = vmatprep.subr.bf16.mxu0 %v1681_v12 }
  0xa5   :  { %1487 = vmatpush3.bf16.msra.mxu0 %v1839_v58 }
  0xa6   :  { %1512 = vmatprep.subr.bf16.mxu0 %v1681_v12 }
  0xa8   :  { %1207 = vmatmul.mubr.f32.vlgmr.msra.gmra.mrb[8].mxu0 %v1682_v22 }
  0xa9   :  { %1514 = vmatpush3.bf16.msra.mxu0 %v1755_v26  ;;  %1276 = vmatprep.mubr.msk.f32.mxu0 %vm1683_vm12, %v1682_v22 }
  0xaa   :  { %1515 = vmatprep.subr.bf16.mxu0 %v1681_v12 }
  0xad   :  { %1517 = vmatpush3.bf16.msra.mxu0 %v1769_v34 }
  0xae   :  { %1518 = vmatprep.subr.bf16.mxu0 %v1681_v12 }
  0xb1   :  { %1520 = vmatpush3.bf16.msra.mxu0 %v1783_v40 }
  0xb2   :  { %1521 = vmatprep.subr.bf16.mxu0 %v1681_v12 }
  0xb5   :  { %1523 = vmatpush3.bf16.msra.mxu0 %v1796_v45 }
  0xb6   :  { %1524 = vmatprep.subr.bf16.mxu0 %v1681_v12 }
  0xb9   :  { %1526 = vmatpush3.bf16.msra.mxu0 %v1808_v49 }
  0xba   :  { %1527 = vmatprep.subr.bf16.mxu0 %v1681_v12 }
  0xbd   :  { %1529 = vmatpush3.bf16.msra.mxu0 %v1818_v52 }
  0xbe   :  { %1530 = vmatprep.subr.bf16.mxu0 %v1681_v12 }
  0xc1   :  { %1532 = vmatpush3.bf16.msra.mxu0 %v1828_v55 }
  0xc2   :  { %1533 = vmatprep.subr.bf16.mxu0 %v1681_v12 }
  0xc5   :  { %1535 = vmatpush3.bf16.msra.mxu0 %v1839_v58 }
  0xc6   :  { %1560 = vmatprep.subr.bf16.mxu0 %v1681_v12 }
 0x15b   :  { %v1148_v59 = vpop.f32.mrb[0].mxu0 }
 0x15c   :  { %v172_v60 = vpop.f32.mrb[1].mxu0 }
 0x15d   :  { %1162 = vmatprep.mubr.msk.f32.mxu1 %vm213_vm13, %v172_v60 }
 0x15e   :  { %1163 = vmatmul.mubr.msk.f32.vlgmr.msra.gmra.mrb[0].mxu1 %vm213_vm13, %v1148_v59 }
 0x15f   :  { %v1151_v61 = vpop.f32.mrb[2].mxu0  ;;  %1490 = vmatpush3.bf16.msra.mxu1 %v1755_v26 }
 0x160   :  { %v182_v62 = vpop.f32.mrb[3].mxu0  ;;  %1491 = vmatprep.subr.bf16.mxu1 %v1681_v12 }
 0x161   :  { %1165 = vmatprep.mubr.msk.f32.mxu1 %vm213_vm13, %v182_v62 }
 0x162   :  { %1166 = vmatmul.mubr.msk.f32.gmra.mrb[2].mxu1 %vm213_vm13, %v1151_v61 }
 0x163   :  { %v1154_v63 = vpop.f32.mrb[4].mxu0  ;;  %1493 = vmatpush3.bf16.msra.mxu1 %v1769_v34 }
 0x164   :  { %v192_v0 = vpop.f32.mrb[5].mxu0  ;;  %1494 = vmatprep.subr.bf16.mxu1 %v1681_v12 }
 0x165   :  { %1168 = vmatprep.mubr.msk.f32.mxu1 %vm213_vm13, %v192_v0 }
 0x166   :  { %1169 = vmatmul.mubr.msk.f32.gmra.mrb[4].mxu1 %vm213_vm13, %v1154_v63 }
 0x167   :  { %v1157_v1 = vpop.f32.mrb[6].mxu0  ;;  %1496 = vmatpush3.bf16.msra.mxu1 %v1783_v40 }
 0x168   :  { %v202_v2 = vpop.f32.mrb[7].mxu0  ;;  %1497 = vmatprep.subr.bf16.mxu1 %v1681_v12 }
 0x169   :  { %1171 = vmatprep.mubr.msk.f32.mxu1 %vm213_vm13, %v202_v2 }
 0x16a   :  { %1172 = vmatmul.mubr.msk.f32.gmra.mrb[6].mxu1 %vm213_vm13, %v1157_v1 }
 0x16b   :  { %1499 = vmatpush3.bf16.msra.mxu1 %v1796_v45  ;;  %1241 = vmatprep.mubr.msk.f32.mxu1 %vm1683_vm12, %v1682_v22 }
 0x16c   :  { %1500 = vmatprep.subr.bf16.mxu1 %v1681_v12 }
 0x16f   :  { %1502 = vmatpush3.bf16.msra.mxu1 %v1808_v49 }
 0x170   :  { %1503 = vmatprep.subr.bf16.mxu1 %v1681_v12 }
 0x173   :  { %1505 = vmatpush3.bf16.msra.mxu1 %v1818_v52 }
 0x174   :  { %1506 = vmatprep.subr.bf16.mxu1 %v1681_v12 }
 0x177   :  { %1508 = vmatpush3.bf16.msra.mxu1 %v1828_v55 }
 0x178   :  { %1509 = vmatprep.subr.bf16.mxu1 %v1681_v12 }
 0x17b   :  { %1511 = vmatpush3.bf16.msra.mxu1 %v1839_v58  ;;  %v425_v3 = vpop.f32.mrb[8].mxu0 }
 0x17c   :  { %1536 = vmatprep.subr.bf16.mxu1 %v1681_v12  ;;  %v1208_v4 = vpop.f32.mrb[9].mxu0 }
 0x231   :  { %v1164_v5 = vpop.f32.mrb[0].mxu1 }
 0x232   :  { %v304_v6 = vpop.f32.mrb[1].mxu1 }
 0x233   :  { %v429_v7 = vadd.f32 %v425_v3, %v304_v6 }
 0x235   :  { %1663 = vtanh.f32 %v429_v7  ;;  %v1890_v8 = vpop.f32.mrb[2].mxu1 }
 0x236   :  { %v314_v9 = vpop.f32.mrb[3].mxu1 }
 0x239   :  { %v1892_v10 = vpop.f32.mrb[4].mxu1 }
 0x23a   :  { %v1894_v11 = vpop.f32.mrb[5].mxu1 }
 0x23d   :  { %v1896_v13 = vpop.f32.mrb[6].mxu1 }
 0x23e   :  { %v1898_v14 = vpop.f32.mrb[7].mxu1 }
 0x23f   :  { %v1664_v15 = vpop.eup %1663 }
 0x240   :  { %431 = vst [vmem:[%s2021_s4] sm:$0xff] %v1664_v15  ;;  %1242 = vmatmul.mubr.f32.vlgmr.msra.gmra.mrb[8].mxu1 %v1664_v15 }
 0x241   :  { %1538 = vmatpush3.bf16.msra.mxu1 %v1755_v26  ;;  %1311 = vmatprep.mubr.msk.f32.mxu1 %vm1683_vm12, %v1682_v22 }
 0x242   :  { %1539 = vmatprep.subr.bf16.mxu1 %v1681_v12 }
 0x245   :  { %1541 = vmatpush3.bf16.msra.mxu1 %v1769_v34 }
 0x246   :  { %1542 = vmatprep.subr.bf16.mxu1 %v1681_v12 }
 0x249   :  { %1544 = vmatpush3.bf16.msra.mxu1 %v1783_v40 }
 0x24a   :  { %1545 = vmatprep.subr.bf16.mxu1 %v1681_v12 }
 0x24d   :  { %1547 = vmatpush3.bf16.msra.mxu1 %v1796_v45 }
 0x24e   :  { %1548 = vmatprep.subr.bf16.mxu1 %v1681_v12 }
 0x251   :  { %1550 = vmatpush3.bf16.msra.mxu1 %v1808_v49 }
 0x252   :  { %1551 = vmatprep.subr.bf16.mxu1 %v1681_v12 }
 0x255   :  { %1553 = vmatpush3.bf16.msra.mxu1 %v1818_v52 }
 0x256   :  { %1554 = vmatprep.subr.bf16.mxu1 %v1681_v12 }
 0x259   :  { %1556 = vmatpush3.bf16.msra.mxu1 %v1828_v55 }
 0x25a   :  { %1557 = vmatprep.subr.bf16.mxu1 %v1681_v12 }
 0x25d   :  { %1559 = vmatpush3.bf16.msra.mxu1 %v1839_v58 }
 0x25e   :  { %1584 = vmatprep.subr.bf16.mxu1 %v1681_v12 }
 0x313   :  { %v498_v16 = vpop.f32.mrb[8].mxu1 }
 0x314   :  { %v502_v17 = vadd.f32 %v1164_v5, %v498_v16  ;;  %v1243_v18 = vpop.f32.mrb[9].mxu1 }
 0x316   :  { %1665 = vtanh.f32 %v502_v17 }
 0x320   :  { %v1666_v19 = vpop.eup %1665 }
 0x321   :  { %979 = vst [vmem:[%s2021_s4 + $0x8] sm:$0xff] %v1666_v19  ;;  %1277 = vmatmul.mubr.f32.vlgmr.msra.gmra.mrb[10].mxu0 %v1666_v19 }
 0x322   :  { %1562 = vmatpush3.bf16.msra.mxu0 %v1755_v26  ;;  %1346 = vmatprep.mubr.msk.f32.mxu0 %vm1683_vm12, %v1682_v22 }
 0x323   :  { %1563 = vmatprep.subr.bf16.mxu0 %v1681_v12 }
 0x326   :  { %1565 = vmatpush3.bf16.msra.mxu0 %v1769_v34 }
 0x327   :  { %1566 = vmatprep.subr.bf16.mxu0 %v1681_v12 }
 0x32a   :  { %1568 = vmatpush3.bf16.msra.mxu0 %v1783_v40 }
 0x32b   :  { %1569 = vmatprep.subr.bf16.mxu0 %v1681_v12 }
 0x32e   :  { %1571 = vmatpush3.bf16.msra.mxu0 %v1796_v45 }
 0x32f   :  { %1572 = vmatprep.subr.bf16.mxu0 %v1681_v12 }
 0x332   :  { %1574 = vmatpush3.bf16.msra.mxu0 %v1808_v49 }
 0x333   :  { %1575 = vmatprep.subr.bf16.mxu0 %v1681_v12 }
 0x336   :  { %1577 = vmatpush3.bf16.msra.mxu0 %v1818_v52 }
 0x337   :  { %1578 = vmatprep.subr.bf16.mxu0 %v1681_v12 }
 0x33a   :  { %1580 = vmatpush3.bf16.msra.mxu0 %v1828_v55 }
 0x33b   :  { %1581 = vmatprep.subr.bf16.mxu0 %v1681_v12 }
 0x33e   :  { %1583 = vmatpush3.bf16.msra.mxu0 %v1839_v58 }
 0x33f   :  { %1608 = vmatprep.subr.bf16.mxu0 %v1681_v12 }
 0x3f4   :  { %v572_v20 = vpop.f32.mrb[10].mxu0 }
 0x3f5   :  { %v576_v21 = vadd.f32 %v572_v20, %v314_v9  ;;  %v1278_v23 = vpop.f32.mrb[11].mxu0 }
 0x3f7   :  { %1667 = vtanh.f32 %v576_v21 }
 0x401   :  { %v1668_v24 = vpop.eup %1667 }
 0x402   :  { %980 = vst [vmem:[%s2021_s4 + $0x10] sm:$0xff] %v1668_v24  ;;  %1312 = vmatmul.mubr.f32.vlgmr.msra.gmra.mrb[10].mxu1 %v1668_v24 }
 0x403   :  { %1586 = vmatpush3.bf16.msra.mxu1 %v1755_v26  ;;  %1381 = vmatprep.mubr.msk.f32.mxu1 %vm1683_vm12, %v1682_v22 }
 0x404   :  { %1587 = vmatprep.subr.bf16.mxu1 %v1681_v12 }
 0x407   :  { %1589 = vmatpush3.bf16.msra.mxu1 %v1769_v34 }
 0x408   :  { %1590 = vmatprep.subr.bf16.mxu1 %v1681_v12 }
 0x40b   :  { %1592 = vmatpush3.bf16.msra.mxu1 %v1783_v40 }
 0x40c   :  { %1593 = vmatprep.subr.bf16.mxu1 %v1681_v12 }
 0x40f   :  { %1595 = vmatpush3.bf16.msra.mxu1 %v1796_v45 }
 0x410   :  { %1596 = vmatprep.subr.bf16.mxu1 %v1681_v12 }
 0x413   :  { %1598 = vmatpush3.bf16.msra.mxu1 %v1808_v49 }
 0x414   :  { %1599 = vmatprep.subr.bf16.mxu1 %v1681_v12 }
 0x417   :  { %1601 = vmatpush3.bf16.msra.mxu1 %v1818_v52 }
 0x418   :  { %1602 = vmatprep.subr.bf16.mxu1 %v1681_v12 }
 0x41b   :  { %1604 = vmatpush3.bf16.msra.mxu1 %v1828_v55 }
 0x41c   :  { %1605 = vmatprep.subr.bf16.mxu1 %v1681_v12 }
 0x41f   :  { %1607 = vmatpush3.bf16.msra.mxu1 %v1839_v58 }
 0x420   :  { %1632 = vmatprep.subr.bf16.mxu1 %v1681_v12 }
 0x4d5   :  { %v646_v25 = vpop.f32.mrb[10].mxu1 }
 0x4d6   :  { %v650_v27 = vadd.f32 %v1890_v8, %v646_v25  ;;  %v1313_v28 = vpop.f32.mrb[11].mxu1 }
 0x4d8   :  { %1669 = vtanh.f32 %v650_v27 }
 0x4e2   :  { %v1670_v29 = vpop.eup %1669 }
 0x4e3   :  { %981 = vst [vmem:[%s2021_s4 + $0x18] sm:$0xff] %v1670_v29  ;;  %1347 = vmatmul.mubr.f32.vlgmr.msra.gmra.mrb[12].mxu0 %v1670_v29 }
 0x4e4   :  { %1610 = vmatpush3.bf16.msra.mxu0 %v1755_v26  ;;  %1416 = vmatprep.mubr.msk.f32.mxu0 %vm1683_vm12, %v1682_v22 }
 0x4e5   :  { %1611 = vmatprep.subr.bf16.mxu0 %v1681_v12 }
 0x4e8   :  { %1613 = vmatpush3.bf16.msra.mxu0 %v1769_v34 }
 0x4e9   :  { %1614 = vmatprep.subr.bf16.mxu0 %v1681_v12 }
 0x4ec   :  { %1616 = vmatpush3.bf16.msra.mxu0 %v1783_v40 }
 0x4ed   :  { %1617 = vmatprep.subr.bf16.mxu0 %v1681_v12 }
 0x4f0   :  { %1619 = vmatpush3.bf16.msra.mxu0 %v1796_v45 }
 0x4f1   :  { %1620 = vmatprep.subr.bf16.mxu0 %v1681_v12 }
 0x4f4   :  { %1622 = vmatpush3.bf16.msra.mxu0 %v1808_v49 }
 0x4f5   :  { %1623 = vmatprep.subr.bf16.mxu0 %v1681_v12 }
 0x4f8   :  { %1625 = vmatpush3.bf16.msra.mxu0 %v1818_v52 }
 0x4f9   :  { %1626 = vmatprep.subr.bf16.mxu0 %v1681_v12 }
 0x4fc   :  { %1628 = vmatpush3.bf16.msra.mxu0 %v1828_v55 }
 0x4fd   :  { %1629 = vmatprep.subr.bf16.mxu0 %v1681_v12 }
 0x500   :  { %1631 = vmatpush3.bf16.msra.mxu0 %v1839_v58 }
 0x5b6   :  { %v720_v30 = vpop.f32.mrb[12].mxu0 }
 0x5b7   :  { %v724_v31 = vadd.f32 %v720_v30, %v1894_v11  ;;  %v1348_v32 = vpop.f32.mrb[13].mxu0 }
 0x5b9   :  { %1671 = vtanh.f32 %v724_v31 }
 0x5c3   :  { %v1672_v33 = vpop.eup %1671 }
 0x5c4   :  { %982 = vst [vmem:[%s2021_s4 + $0x20] sm:$0xff] %v1672_v33  ;;  %1382 = vmatmul.mubr.f32.vlgmr.msra.gmra.mrb[12].mxu1 %v1672_v33 }
 0x5c5   :  { %1634 = vmatpush3.bf16.msra.mxu1 %v1755_v26  ;;  %1451 = vmatprep.mubr.msk.f32.mxu1 %vm1683_vm12, %v1682_v22 }
 0x5c6   :  { %1635 = vmatprep.subr.bf16.mxu1 %v1681_v12 }
 0x5c9   :  { %1637 = vmatpush3.bf16.msra.mxu1 %v1769_v34 }
 0x5ca   :  { %1638 = vmatprep.subr.bf16.mxu1 %v1681_v12 }
 0x5cd   :  { %1640 = vmatpush3.bf16.msra.mxu1 %v1783_v40 }
 0x5ce   :  { %1641 = vmatprep.subr.bf16.mxu1 %v1681_v12 }
 0x5d1   :  { %1643 = vmatpush3.bf16.msra.mxu1 %v1796_v45 }
 0x5d2   :  { %1644 = vmatprep.subr.bf16.mxu1 %v1681_v12 }
 0x5d5   :  { %1646 = vmatpush3.bf16.msra.mxu1 %v1808_v49 }
 0x5d6   :  { %1647 = vmatprep.subr.bf16.mxu1 %v1681_v12 }
 0x5d9   :  { %1649 = vmatpush3.bf16.msra.mxu1 %v1818_v52 }
 0x5da   :  { %1650 = vmatprep.subr.bf16.mxu1 %v1681_v12 }
 0x5dd   :  { %1652 = vmatpush3.bf16.msra.mxu1 %v1828_v55 }
 0x5de   :  { %1653 = vmatprep.subr.bf16.mxu1 %v1681_v12 }
 0x5e1   :  { %1655 = vmatpush3.bf16.msra.mxu1 %v1839_v58 }
 0x697   :  { %v794_v22 = vpop.f32.mrb[12].mxu1 }
 0x698   :  { %v798_v26 = vadd.f32 %v1892_v10, %v794_v22  ;;  %v1383_v34 = vpop.f32.mrb[13].mxu1 }
 0x69a   :  { %1673 = vtanh.f32 %v798_v26 }
 0x6a4   :  { %v1674_v35 = vpop.eup %1673 }
 0x6a5   :  { %983 = vst [vmem:[%s2021_s4 + $0x28] sm:$0xff] %v1674_v35  ;;  %1417 = vmatmul.mubr.f32.vlgmr.msra.gmra.mrb[14].mxu0 %v1674_v35 }
 0x778   :  { %v868_v36 = vpop.f32.mrb[14].mxu0 }
 0x779   :  { %v872_v37 = vadd.f32 %v868_v36, %v1898_v14  ;;  %v1418_v38 = vpop.f32.mrb[15].mxu0 }
 0x77b   :  { %1675 = vtanh.f32 %v872_v37 }
 0x785   :  { %v1676_v39 = vpop.eup %1675 }
 0x786   :  { %984 = vst [vmem:[%s2021_s4 + $0x30] sm:$0xff] %v1676_v39  ;;  %1452 = vmatmul.mubr.f32.vlgmr.msra.gmra.mrb[14].mxu1 %v1676_v39 }
 0x859   :  { %v942_v12 = vpop.f32.mrb[14].mxu1 }
 0x85a   :  { %v946_v40 = vadd.f32 %v1896_v13, %v942_v12  ;;  %v1453_v41 = vpop.f32.mrb[15].mxu1 }
 0x85c   :  { %1677 = vtanh.f32 %v946_v40 }
 0x866   :  { %v1678_v42 = vpop.eup %1677 }
 0x867   :  { %985 = vst [vmem:[%s2021_s4 + $0x38] sm:$0xff] %v1678_v42 }

</bundles_post_ra>
